<compile_context>
chip_gen: v7x
topology: tpu7x:2x2x1
jax: 0.10.0
libtpu: 0.0.40
codegen_flags: <defaults>
</compile_context>

<pallas_src>
import functools

import jax
import jax.numpy as jnp
from jax import lax
from jax.experimental import pallas as pl
from jax.experimental.pallas import tpu as pltpu

_EPS = 1e-6


def _round_up(x: int, m: int) -> int:
    return ((x + m - 1) // m) * m


def _prob_linear_kernel(x_ref, wval_ref, wvar_ref, uw_ref,
                        bval_ref, bvar_ref, ub_ref,
                        o_ref, acc_ref):
    k = pl.program_id(2)

    @pl.when(k == 0)
    def _():
        acc_ref[...] = jnp.zeros_like(acc_ref)

    eps = jnp.float32(_EPS)

    # ---- sample weight tile ~ U(w_val - |w_var|, w_val + |w_var| + eps) ----
    w_val = wval_ref[...]                       # (tn, tk)
    w_spread = jnp.abs(wvar_ref[...])           # (tn, tk)
    # low + u * (high - low), high - low = 2*|w_var| + eps
    weight = (w_val - w_spread) + uw_ref[...] * (2.0 * w_spread + eps)

    # ---- partial matmul on the (out, in) layout (no transpose copy) --------
    acc_ref[...] += lax.dot_general(
        x_ref[...], weight,
        dimension_numbers=(((1,), (1,)), ((), ())),
        preferred_element_type=jnp.float32)

    @pl.when(k == pl.num_programs(2) - 1)
    def _():
        # ---- sample bias tile and write out --------------------------------
        b_val = bval_ref[...]                   # (1, tn)
        b_spread = jnp.abs(bvar_ref[...])       # (1, tn)
        bias = (b_val - b_spread) + ub_ref[...] * (2.0 * b_spread + eps)
        o_ref[...] = (acc_ref[...] + bias).astype(o_ref.dtype)


@functools.partial(jax.jit, static_argnames=("tm", "tn", "tk"))
def probabilistic_linear(x, w_val, w_var, b_val, b_var, u_w, u_b,
                         *, tm=128, tn=256, tk=512):
    """x: (B, in); w_*: (out, in); b_*: (out,); u_w: (out, in); u_b: (out,)."""
    batch, in_features = x.shape
    out_features = w_val.shape[0]

    # Tile sizes: never larger than the (aligned) problem dims.
    tm = min(tm, _round_up(batch, 8))
    tn = min(tn, _round_up(out_features, 128))
    tk = min(tk, _round_up(in_features, 128))

    b_pad = _round_up(batch, tm)
    out_pad = _round_up(out_features, tn)
    in_pad = _round_up(in_features, tk)

    def pad2(a, rows, cols):
        return jnp.pad(a, ((0, rows - a.shape[0]), (0, cols - a.shape[1])))

    x_p = pad2(x.astype(jnp.float32), b_pad, in_pad)
    wval_p = pad2(w_val.astype(jnp.float32), out_pad, in_pad)
    wvar_p = pad2(w_var.astype(jnp.float32), out_pad, in_pad)
    uw_p = pad2(u_w.astype(jnp.float32), out_pad, in_pad)
    bval_p = pad2(b_val.reshape(1, -1).astype(jnp.float32), 1, out_pad)
    bvar_p = pad2(b_var.reshape(1, -1).astype(jnp.float32), 1, out_pad)
    ub_p = pad2(u_b.reshape(1, -1).astype(jnp.float32), 1, out_pad)

    grid = (b_pad // tm, out_pad // tn, in_pad // tk)

    grid_spec = pltpu.PrefetchScalarGridSpec(
        num_scalar_prefetch=0,
        grid=grid,
        in_specs=[
            pl.BlockSpec((tm, tk), lambda i, j, k: (i, k)),   # x
            pl.BlockSpec((tn, tk), lambda i, j, k: (j, k)),   # w_val
            pl.BlockSpec((tn, tk), lambda i, j, k: (j, k)),   # w_var
            pl.BlockSpec((tn, tk), lambda i, j, k: (j, k)),   # u_w
            pl.BlockSpec((1, tn), lambda i, j, k: (0, j)),    # b_val
            pl.BlockSpec((1, tn), lambda i, j, k: (0, j)),    # b_var
            pl.BlockSpec((1, tn), lambda i, j, k: (0, j)),    # u_b
        ],
        out_specs=pl.BlockSpec((tm, tn), lambda i, j, k: (i, j)),
        scratch_shapes=[pltpu.VMEM((tm, tn), jnp.float32)],
    )

    out_padded = pl.pallas_call(
        _prob_linear_kernel,
        out_shape=jax.ShapeDtypeStruct((b_pad, out_pad), jnp.float32),
        grid_spec=grid_spec,
        compiler_params=pltpu.CompilerParams(
            dimension_semantics=("parallel", "parallel", "arbitrary")),
    )(x_p, wval_p, wvar_p, uw_p, bval_p, bvar_p, ub_p)

    return out_padded[:batch, :out_features]


if __name__ == "__main__":
    # Small shapes consistent with a linear layer.
    batch, in_features, out_features = 8, 32, 32

    key = jax.random.PRNGKey(0)
    kx, kw, kb, kuw, kub = jax.random.split(key, 5)

    # Parameter init mirroring the module's __init__ (init_type='fan_in'):
    kaiming_scale = jnp.sqrt(jnp.float32(6.0 / in_features))
    w_val = jax.random.normal(kw, (out_features, in_features), jnp.float32) * kaiming_scale
    w_var = jnp.ones((out_features, in_features), jnp.float32) * kaiming_scale
    b_val = jax.random.normal(kb, (out_features,), jnp.float32) * kaiming_scale
    b_var = jnp.ones((out_features,), jnp.float32) * kaiming_scale

    x = jax.random.normal(kx, (batch, in_features), jnp.float32)

    # Uniform draws in [0, 1) (the .rsample() reparameterization noise).
    u_w = jax.random.uniform(kuw, (out_features, in_features), jnp.float32)
    u_b = jax.random.uniform(kub, (out_features,), jnp.float32)

    out = probabilistic_linear(x, w_val, w_var, b_val, b_var, u_w, u_b)
    out = jax.block_until_ready(out)

    # Pure-JAX reference using the same uniforms.
    eps = jnp.float32(_EPS)
    w_spread = jnp.abs(w_var)
    weight_ref = (w_val - w_spread) + u_w * (2.0 * w_spread + eps)
    b_spread = jnp.abs(b_var)
    bias_ref = (b_val - b_spread) + u_b * (2.0 * b_spread + eps)
    ref = x @ weight_ref.T + bias_ref

    assert out.shape == (batch, out_features)
    assert jnp.all(jnp.isfinite(out))
    assert jnp.allclose(out, ref, rtol=1e-4, atol=1e-4), \
        float(jnp.max(jnp.abs(out - ref)))

    print("KERNEL_OK")
</pallas_src>

<mosaic_0001>
module attributes {stable_mosaic.version = 11 : i64} {
  func.func @_prob_linear_kernel(%arg0: i32, %arg1: i32, %arg2: i32, %arg3: memref<8x128xf32, #tpu.memory_space<vmem>>, %arg4: memref<128x128xf32, #tpu.memory_space<vmem>>, %arg5: memref<128x128xf32, #tpu.memory_space<vmem>>, %arg6: memref<128x128xf32, #tpu.memory_space<vmem>>, %arg7: memref<1x128xf32, #tpu.memory_space<vmem>>, %arg8: memref<1x128xf32, #tpu.memory_space<vmem>>, %arg9: memref<1x128xf32, #tpu.memory_space<vmem>>, %arg10: memref<8x128xf32, #tpu.memory_space<vmem>>, %arg11: memref<8x128xf32, #tpu.memory_space<vmem>>) attributes {dimension_semantics = [#tpu.dimension_semantics<parallel>, #tpu.dimension_semantics<parallel>, #tpu.dimension_semantics<arbitrary>], iteration_bounds = array<i64: 1, 1, 1>, scalar_prefetch = 0 : i64, scratch_operands = 1 : i64, tpu.core_type = #tpu.core_type<tc>, window_params = [{transform_indices = @transform_0, window_bounds = array<i64: 8, 128>}, {transform_indices = @transform_1, window_bounds = array<i64: 128, 128>}, {transform_indices = @transform_2, window_bounds = array<i64: 128, 128>}, {transform_indices = @transform_3, window_bounds = array<i64: 128, 128>}, {transform_indices = @transform_4, window_bounds = array<i64: 1, 128>}, {transform_indices = @transform_5, window_bounds = array<i64: 1, 128>}, {transform_indices = @transform_6, window_bounds = array<i64: 1, 128>}, {transform_indices = @transform_7, window_bounds = array<i64: 8, 128>}]} {
    %c0_i32 = arith.constant 0 : i32
    %0 = arith.cmpi eq, %arg2, %c0_i32 : i32
    %1 = arith.extui %0 : i1 to i32
    %c0_i32_0 = arith.constant 0 : i32
    %2 = arith.cmpi ne, %1, %c0_i32_0 : i32
    scf.if %2 {
      %cst_17 = arith.constant 0.000000e+00 : f32
      %22 = vector.broadcast %cst_17 : f32 to vector<8x128xf32>
      %c0_18 = arith.constant 0 : index
      %c0_19 = arith.constant 0 : index
      %23 = vector.load %arg11[%c0_18, %c0_19] : memref<8x128xf32, #tpu.memory_space<vmem>>, vector<8x128xf32>
      tpu.vector_store %arg11[%c0_18, %c0_19], %22 {strides = array<i32>} : memref<8x128xf32, #tpu.memory_space<vmem>>, vector<8x128xf32>,
    } else {
    }
    %c0 = arith.constant 0 : index
    %c0_1 = arith.constant 0 : index
    %3 = vector.load %arg4[%c0, %c0_1] : memref<128x128xf32, #tpu.memory_space<vmem>>, vector<128x128xf32>
    %c0_2 = arith.constant 0 : index
    %c0_3 = arith.constant 0 : index
    %4 = vector.load %arg5[%c0_2, %c0_3] : memref<128x128xf32, #tpu.memory_space<vmem>>, vector<128x128xf32>
    %5 = math.absf %4 : vector<128x128xf32>
    %6 = arith.subf %3, %5 : vector<128x128xf32>
    %c0_4 = arith.constant 0 : index
    %c0_5 = arith.constant 0 : index
    %7 = vector.load %arg6[%c0_4, %c0_5] : memref<128x128xf32, #tpu.memory_space<vmem>>, vector<128x128xf32>
    %cst = arith.constant 2.000000e+00 : f32
    %8 = vector.broadcast %cst : f32 to vector<128x128xf32>
    %9 = arith.mulf %8, %5 : vector<128x128xf32>
    %cst_6 = arith.constant 9.99999997E-7 : f32
    %10 = vector.broadcast %cst_6 : f32 to vector<128x128xf32>
    %11 = arith.addf %9, %10 : vector<128x128xf32>
    %12 = arith.mulf %7, %11 : vector<128x128xf32>
    %13 = arith.addf %6, %12 : vector<128x128xf32>
    %c0_7 = arith.constant 0 : index
    %c0_8 = arith.constant 0 : index
    %14 = vector.load %arg11[%c0_7, %c0_8] : memref<8x128xf32, #tpu.memory_space<vmem>>, vector<8x128xf32>
    %c0_9 = arith.constant 0 : index
    %c0_10 = arith.constant 0 : index
    %15 = vector.load %arg3[%c0_9, %c0_10] : memref<8x128xf32, #tpu.memory_space<vmem>>, vector<8x128xf32>
    %cst_11 = arith.constant dense<0.000000e+00> : vector<8x128xf32>
    %16 = tpu.matmul %15, %13, %cst_11 {dimension_numbers = #tpu.dot_dimension_numbers<[1], [1], [0], [0], [0, 0, 1, 0], [], []>} : vector<8x128xf32>, vector<128x128xf32>, vector<8x128xf32> -> vector<8x128xf32>
    %17 = arith.addf %14, %16 : vector<8x128xf32>
    %c0_12 = arith.constant 0 : index
    %c0_13 = arith.constant 0 : index
    %18 = vector.load %arg11[%c0_12, %c0_13] : memref<8x128xf32, #tpu.memory_space<vmem>>, vector<8x128xf32>
    tpu.vector_store %arg11[%c0_12, %c0_13], %17 {strides = array<i32>} : memref<8x128xf32, #tpu.memory_space<vmem>>, vector<8x128xf32>,
    %c0_i32_14 = arith.constant 0 : i32
    %19 = arith.cmpi eq, %arg2, %c0_i32_14 : i32
    %20 = arith.extui %19 : i1 to i32
    %cst_15 = arith.constant 9.99999997E-7 : f32
    %c0_i32_16 = arith.constant 0 : i32
    %21 = arith.cmpi ne, %20, %c0_i32_16 : i32
    scf.if %21 {
      %c0_17 = arith.constant 0 : index
      %c0_18 = arith.constant 0 : index
      %22 = vector.load %arg7[%c0_17, %c0_18] : memref<1x128xf32, #tpu.memory_space<vmem>>, vector<1x128xf32>
      %c0_19 = arith.constant 0 : index
      %c0_20 = arith.constant 0 : index
      %23 = vector.load %arg8[%c0_19, %c0_20] : memref<1x128xf32, #tpu.memory_space<vmem>>, vector<1x128xf32>
      %24 = math.absf %23 : vector<1x128xf32>
      %25 = arith.subf %22, %24 : vector<1x128xf32>
      %c0_21 = arith.constant 0 : index
      %c0_22 = arith.constant 0 : index
      %26 = vector.load %arg9[%c0_21, %c0_22] : memref<1x128xf32, #tpu.memory_space<vmem>>, vector<1x128xf32>
      %cst_23 = arith.constant 2.000000e+00 : f32
      %27 = vector.broadcast %cst_23 : f32 to vector<1x128xf32>
      %28 = arith.mulf %27, %24 : vector<1x128xf32>
      %29 = vector.broadcast %cst_15 : f32 to vector<1x128xf32>
      %30 = arith.addf %28, %29 : vector<1x128xf32>
      %31 = arith.mulf %26, %30 : vector<1x128xf32>
      %32 = arith.addf %25, %31 : vector<1x128xf32>
      %c0_24 = arith.constant 0 : index
      %c0_25 = arith.constant 0 : index
      %33 = vector.load %arg11[%c0_24, %c0_25] : memref<8x128xf32, #tpu.memory_space<vmem>>, vector<8x128xf32>
      %34 = vector.broadcast %32 : vector<1x128xf32> to vector<8x128xf32>
      %35 = arith.addf %33, %34 : vector<8x128xf32>
      %c0_26 = arith.constant 0 : index
      %c0_27 = arith.constant 0 : index
      %36 = vector.load %arg10[%c0_26, %c0_27] : memref<8x128xf32, #tpu.memory_space<vmem>>, vector<8x128xf32>
      tpu.vector_store %arg10[%c0_26, %c0_27], %35 {strides = array<i32>} : memref<8x128xf32, #tpu.memory_space<vmem>>, vector<8x128xf32>,
    } else {
    }
    return
  }
  func.func @transform_0(%arg0: i32, %arg1: i32, %arg2: i32) -> (i32, i32) {
    %c0_i32 = arith.constant 0 : i32
    return %arg0, %arg2 : i32, i32
  }
  func.func @transform_1(%arg0: i32, %arg1: i32, %arg2: i32) -> (i32, i32) {
    %c0_i32 = arith.constant 0 : i32
    return %arg1, %arg2 : i32, i32
  }
  func.func @transform_2(%arg0: i32, %arg1: i32, %arg2: i32) -> (i32, i32) {
    %c0_i32 = arith.constant 0 : i32
    return %arg1, %arg2 : i32, i32
  }
  func.func @transform_3(%arg0: i32, %arg1: i32, %arg2: i32) -> (i32, i32) {
    %c0_i32 = arith.constant 0 : i32
    return %arg1, %arg2 : i32, i32
  }
  func.func @transform_4(%arg0: i32, %arg1: i32, %arg2: i32) -> (i32, i32) {
    %c0_i32 = arith.constant 0 : i32
    %c0_i32_0 = arith.constant 0 : i32
    return %c0_i32, %arg1 : i32, i32
  }
  func.func @transform_5(%arg0: i32, %arg1: i32, %arg2: i32) -> (i32, i32) {
    %c0_i32 = arith.constant 0 : i32
    %c0_i32_0 = arith.constant 0 : i32
    return %c0_i32, %arg1 : i32, i32
  }
  func.func @transform_6(%arg0: i32, %arg1: i32, %arg2: i32) -> (i32, i32) {
    %c0_i32 = arith.constant 0 : i32
    %c0_i32_0 = arith.constant 0 : i32
    return %c0_i32, %arg1 : i32, i32
  }
  func.func @transform_7(%arg0: i32, %arg1: i32, %arg2: i32) -> (i32, i32) {
    %c0_i32 = arith.constant 0 : i32
    return %arg0, %arg1 : i32, i32
  }
}

</mosaic_0001>

<bundles_post_ra>
// kernel: probabilistic_linear.1
= control target key start
LH: loop header
LB: loop body
LE: loop exit
PB: predicated region body
PF: predicated region fallthrough
CT: control target
= control target key end

     0   :  { %v389_v1 = vmov 0.0|0.0   ;;  %vm390_vm0 = vmmov 0   ;;  %v391_v4 = vmov 0.0   ;;  %s609_s0 = inlined_call_operand.vmem [shape: f32[8,128], index: 0, kind: input, shape index: {}]   ;;  %s610_s1 = inlined_call_operand.vmem [shape: f32[128,128], index: 1, kind: input, shape index: {}]   ;;  %s611_s2 = inlined_call_operand.vmem [shape: f32[128,128], index: 2, kind: input, shape index: {}]   ;;  %s612_s3 = inlined_call_operand.vmem [shape: f32[128,128], index: 3, kind: input, shape index: {}]   ;;  %s613_s4 = inlined_call_operand.vmem [shape: f32[1,128], index: 4, kind: input, shape index: {}]   ;;  %s614_s5 = inlined_call_operand.vmem [shape: f32[1,128], index: 5, kind: input, shape index: {}]   ;;  %s615_s6 = inlined_call_operand.vmem [shape: f32[1,128], index: 6, kind: input, shape index: {}]   ;;  %s616_s7 = inlined_call_operand.hbm [shape: f32[8,128], index: 7, kind: output, shape index: {}]  }
   0x1   :  { %v48_v0 = vld [vmem:[%s611_s2] sm:$0xff]  ;;  %337 = vmatprep.subr.bf16.mxu0 %v389_v1  ;;  %v49_v2 = vld [vmem:[%s611_s2 + $0x8] sm:$0xff]  ;;  %334 = vmatprep.mubr.msk.f32.mxu0 %vm390_vm0, %v391_v4  ;;  %v50_v7 = vld [vmem:[%s611_s2 + $0x10] sm:$0xff] }
   0x2   :  { %v64_v3 = vand.u32 2147483647, %v48_v0  ;;  %v32_v5 = vld [vmem:[%s610_s1] sm:$0xff]  ;;  %v65_v6 = vand.u32 2147483647, %v49_v2  ;;  %v33_v8 = vld [vmem:[%s610_s1 + $0x8] sm:$0xff] }
   0x3   :  { %v96_v9 = vld [vmem:[%s612_s3] sm:$0xff]  ;;  %v51_v11 = vld [vmem:[%s611_s2 + $0x18] sm:$0xff]  ;;  %v66_v12 = vand.u32 2147483647, %v50_v7  ;;  %v97_v13 = vld [vmem:[%s612_s3 + $0x8] sm:$0xff] }
   0x4   :  { %v112_v10 = vmul.f32 2.0, %v64_v3  ;;  %v113_v14 = vmul.f32 2.0, %v65_v6  ;;  %v34_v15 = vld [vmem:[%s610_s1 + $0x10] sm:$0xff]  ;;  %v67_v16 = vand.u32 2147483647, %v51_v11  ;;  %v52_v17 = vld [vmem:[%s611_s2 + $0x20] sm:$0xff]  ;;  %v80_v18 = vsub.f32 %v32_v5, %v64_v3 }
   0x5   :  { %v114_v20 = vmul.f32 2.0, %v66_v12  ;;  %v53_v21 = vld [vmem:[%s611_s2 + $0x28] sm:$0xff]  ;;  %v68_v22 = vand.u32 2147483647, %v52_v17  ;;  %v81_v23 = vsub.f32 %v33_v8, %v65_v6  ;;  %v35_v25 = vld [vmem:[%s610_s1 + $0x18] sm:$0xff]  ;;  %v98_v29 = vld [vmem:[%s612_s3 + $0x10] sm:$0xff]  ;;  %v82_v35 = vsub.f32 %v34_v15, %v66_v12 }
   0x6   :  { %v128_v19 = vadd.f32 1e-06, %v112_v10  ;;  %v129_v24 = vadd.f32 1e-06, %v113_v14  ;;  %v115_v26 = vmul.f32 2.0, %v67_v16  ;;  %v99_v30 = vld [vmem:[%s612_s3 + $0x18] sm:$0xff]  ;;  %v83_v36 = vsub.f32 %v35_v25, %v67_v16 }
   0x7   :  { %v69_v27 = vand.u32 2147483647, %v53_v21  ;;  %v130_v31 = vadd.f32 1e-06, %v114_v20  ;;  %v116_v37 = vmul.f32 2.0, %v68_v22  ;;  %v54_v42 = vld [vmem:[%s611_s2 + $0x30] sm:$0xff] }
   0x8   :  { %v144_v28 = vmul.f32 %v128_v19, %v96_v9  ;;  %v145_v32 = vmul.f32 %v129_v24, %v97_v13  ;;  %v131_v33 = vadd.f32 1e-06, %v115_v26  ;;  %v55_v43 = vld [vmem:[%s611_s2 + $0x38] sm:$0xff]  ;;  %v70_v46 = vand.u32 2147483647, %v54_v42  ;;  %v36_v49 = vld [vmem:[%s610_s1 + $0x20] sm:$0xff] }
   0x9   :  { %v146_v39 = vmul.f32 %v130_v31, %v98_v29  ;;  %v117_v41 = vmul.f32 2.0, %v69_v27  ;;  %v132_v45 = vadd.f32 1e-06, %v116_v37  ;;  %v100_v50 = vld [vmem:[%s612_s3 + $0x20] sm:$0xff]  ;;  %v71_v52 = vand.u32 2147483647, %v55_v43 }
   0xa   :  { %v160_v34 = vadd.f32 %v144_v28, %v80_v18  ;;  %v161_v38 = vadd.f32 %v145_v32, %v81_v23  ;;  %v147_v40 = vmul.f32 %v131_v33, %v99_v30  ;;  %v37_v53 = vld [vmem:[%s610_s1 + $0x28] sm:$0xff]  ;;  %v84_v55 = vsub.f32 %v36_v49, %v68_v22  ;;  %v56_v62 = vld [vmem:[%s611_s2 + $0x40] sm:$0xff]  ;;  %v38_v0 = vld [vmem:[%s610_s1 + $0x30] sm:$0xff] }
   0xb   :  { %v162_v47 = vadd.f32 %v146_v39, %v82_v35  ;;  %v133_v51 = vadd.f32 1e-06, %v117_v41  ;;  %v101_v54 = vld [vmem:[%s612_s3 + $0x28] sm:$0xff]  ;;  %v148_v56 = vmul.f32 %v132_v45, %v100_v50  ;;  %v118_v57 = vmul.f32 2.0, %v70_v46  ;;  %v39_v3 = vld [vmem:[%s610_s1 + $0x38] sm:$0xff]  ;;  %v102_v4 = vld [vmem:[%s612_s3 + $0x30] sm:$0xff] }
   0xc   :  { %v338_v44 = vpack.c.bf16 %v161_v38, %v160_v34  ;;  %v163_v48 = vadd.f32 %v147_v40, %v83_v36  ;;  %v85_v59 = vsub.f32 %v37_v53, %v69_v27  ;;  %v119_v61 = vmul.f32 2.0, %v71_v52  ;;  %v57_v63 = vld [vmem:[%s611_s2 + $0x48] sm:$0xff] }
   0xd   :  { %v149_v60 = vmul.f32 %v133_v51, %v101_v54  ;;  %v164_v2 = vadd.f32 %v148_v56, %v84_v55  ;;  %v134_v5 = vadd.f32 1e-06, %v118_v57 }
   0xe   :  { %339 = vmatpush3.bf16.xpose.msra.mxu0 %v338_v44  ;;  %v341_v58 = vpack.c.bf16 %v163_v48, %v162_v47 }
   0xf   :  { %340 = vmatprep.subr.bf16.mxu0 %v389_v1 }
  0x10   :  { %12 = vsyncpa [#allocation4], 0  ;;  %v165_v6 = vadd.f32 %v149_v60, %v85_v59  ;;  %v135_v7 = vadd.f32 1e-06, %v119_v61  ;;  %v72_v8 = vand.u32 2147483647, %v56_v62  ;;  %v86_v11 = vsub.f32 %v38_v0, %v70_v46 }
  0x11   :  { %v73_v9 = vand.u32 2147483647, %v57_v63  ;;  %v103_v10 = vld [vmem:[%s612_s3 + $0x38] sm:$0xff]  ;;  %v87_v12 = vsub.f32 %v39_v3, %v71_v52  ;;  %v150_v13 = vmul.f32 %v134_v5, %v102_v4  ;;  %v58_v18 = vld [vmem:[%s611_s2 + $0x50] sm:$0xff]  ;;  %v40_v24 = vld [vmem:[%s610_s1 + $0x40] sm:$0xff] }
  0x12   :  { %v344_v14 = vpack.c.bf16 %v165_v6, %v164_v2  ;;  %v151_v15 = vmul.f32 %v135_v7, %v103_v10  ;;  %v120_v16 = vmul.f32 2.0, %v72_v8  ;;  %v59_v19 = vld [vmem:[%s611_s2 + $0x58] sm:$0xff]  ;;  %v74_v20 = vand.u32 2147483647, %v58_v18  ;;  %v41_v25 = vld [vmem:[%s610_s1 + $0x48] sm:$0xff]  ;;  %v104_v28 = vld [vmem:[%s612_s3 + $0x40] sm:$0xff] }
  0x13   :  { %v121_v17 = vmul.f32 2.0, %v73_v9  ;;  %v75_v21 = vand.u32 2147483647, %v59_v19  ;;  %v166_v22 = vadd.f32 %v150_v13, %v86_v11  ;;  %v105_v29 = vld [vmem:[%s612_s3 + $0x48] sm:$0xff]  ;;  %v88_v30 = vsub.f32 %v40_v24, %v72_v8  ;;  %v60_v37 = vld [vmem:[%s611_s2 + $0x60] sm:$0xff]  ;;  %v42_v39 = vld [vmem:[%s610_s1 + $0x50] sm:$0xff] }
  0x14   :  { %v167_v23 = vadd.f32 %v151_v15, %v87_v12  ;;  %v136_v26 = vadd.f32 1e-06, %v120_v16  ;;  %v89_v31 = vsub.f32 %v41_v25, %v73_v9  ;;  %v122_v32 = vmul.f32 2.0, %v74_v20  ;;  %v61_v38 = vld [vmem:[%s611_s2 + $0x68] sm:$0xff]  ;;  %v43_v44 = vld [vmem:[%s610_s1 + $0x58] sm:$0xff]  ;;  %v106_v45 = vld [vmem:[%s612_s3 + $0x50] sm:$0xff] }
  0x15   :  { %v137_v27 = vadd.f32 1e-06, %v121_v17  ;;  %v123_v36 = vmul.f32 2.0, %v75_v21  ;;  %v76_v41 = vand.u32 2147483647, %v60_v37  ;;  %v107_v48 = vld [vmem:[%s612_s3 + $0x58] sm:$0xff]  ;;  %v90_v49 = vsub.f32 %v42_v39, %v74_v20 }
  0x16   :  { %342 = vmatpush3.bf16.xpose.msra.mxu0 %v341_v58  ;;  %v347_v33 = vpack.c.bf16 %v167_v23, %v166_v22  ;;  %v152_v34 = vmul.f32 %v136_v26, %v104_v28  ;;  %v138_v40 = vadd.f32 1e-06, %v122_v32  ;;  %v77_v47 = vand.u32 2147483647, %v61_v38  ;;  %v62_v56 = vld [vmem:[%s611_s2 + $0x70] sm:$0xff]  ;;  %v63_v57 = vld [vmem:[%s611_s2 + $0x78] sm:$0xff] }
  0x17   :  { %343 = vmatprep.subr.bf16.mxu0 %v389_v1  ;;  %v153_v35 = vmul.f32 %v137_v27, %v105_v29  ;;  %v139_v46 = vadd.f32 1e-06, %v123_v36  ;;  %v91_v50 = vsub.f32 %v43_v44, %v75_v21  ;;  %v124_v54 = vmul.f32 2.0, %v76_v41  ;;  %v44_v62 = vld [vmem:[%s610_s1 + $0x60] sm:$0xff]  ;;  %v45_v63 = vld [vmem:[%s610_s1 + $0x68] sm:$0xff]  ;;  %v47_v17 = vld [vmem:[%s610_s1 + $0x78] sm:$0xff] }
  0x18   :  { %v168_v42 = vadd.f32 %v152_v34, %v88_v30  ;;  %v154_v51 = vmul.f32 %v138_v40, %v106_v45  ;;  %v125_v55 = vmul.f32 2.0, %v77_v47  ;;  %v78_v58 = vand.u32 2147483647, %v62_v56  ;;  %v108_v3 = vld [vmem:[%s612_s3 + $0x60] sm:$0xff]  ;;  %v109_v4 = vld [vmem:[%s612_s3 + $0x68] sm:$0xff]  ;;  %v110_v18 = vld [vmem:[%s612_s3 + $0x70] sm:$0xff] }
  0x19   :  { %v169_v43 = vadd.f32 %v153_v35, %v89_v31  ;;  %v155_v53 = vmul.f32 %v139_v46, %v107_v48  ;;  %v79_v59 = vand.u32 2147483647, %v63_v57  ;;  %v140_v0 = vadd.f32 1e-06, %v124_v54  ;;  %v111_v19 = vld [vmem:[%s612_s3 + $0x78] sm:$0xff]  ;;  %v177_v28 = vld [vmem:[%s609_s0] sm:$0xff] }
  0x1a   :  { %v170_v60 = vadd.f32 %v154_v51, %v90_v49  ;;  %v141_v2 = vadd.f32 1e-06, %v125_v55  ;;  %v92_v5 = vsub.f32 %v44_v62, %v76_v41  ;;  %v93_v6 = vsub.f32 %v45_v63, %v77_v47  ;;  %v254_v29 = vld [vmem:[%s614_s5] sm:$0x1]  ;;  %s392_s0 = smov [#allocation3]  }
  0x1b   :  { %v350_v52 = vpack.c.bf16 %v169_v43, %v168_v42  ;;  %v171_v61 = vadd.f32 %v155_v53, %v91_v50  ;;  %v126_v7 = vmul.f32 2.0, %v78_v58  ;;  %v156_v9 = vmul.f32 %v140_v0, %v108_v3  ;;  %v253_v34 = vld [vmem:[%s613_s4] sm:$0x1]  ;;  %s277_s5 = sshll.u32 %s392_s0, 4  ;;  %s278_s5 = int_to_ptr.vmem [resolvable:$true] %s277_s5 }
  0x1c   :  { %v157_v10 = vmul.f32 %v141_v2, %v109_v4  ;;  %v127_v11 = vmul.f32 2.0, %v79_v59  ;;  %v95_v22 = vsub.f32 %v47_v17, %v79_v59  ;;  %v255_v30 = vand.u32 2147483647, %v254_v29  ;;  %s365_s10 = scalar_lea.vmem %s278_s5, 128  ;;  %p370_p1 = scmp.lt.s32.totalorder %s278_s5, %s278_s5 }
  0x1d   :  { %v353_v8 = vpack.c.bf16 %v171_v61, %v170_v60  ;;  %v172_v12 = vadd.f32 %v156_v9, %v92_v5  ;;  %v142_v15 = vadd.f32 1e-06, %v126_v7  ;;  %p366_p0 = scmp.ne.s32.totalorder %s278_s5, %s365_s10  ;;  %p371_p2 = scmp.lt.s32.totalorder %s365_s10, %s365_s10 }
  0x1e   :  { %345 = vmatpush3.bf16.xpose.msra.mxu0 %v344_v14  ;;  %v173_v13 = vadd.f32 %v157_v10, %v93_v6  ;;  %v46_v14 = vld [vmem:[%s610_s1 + $0x70] sm:$0xff]  ;;  %v143_v16 = vadd.f32 1e-06, %v127_v11  ;;  %v258_v31 = vmul.f32 2.0, %v255_v30  ;;  %v256_v35 = vsub.f32 %v253_v34, %v255_v30 }
  0x1f   :  { %346 = vmatprep.subr.bf16.mxu0 %v389_v1  ;;  %v94_v20 = vsub.f32 %v46_v14, %v78_v58  ;;  %v158_v23 = vmul.f32 %v142_v15, %v110_v18  ;;  %p372_p3 = por %p371_p2, %p370_p1 }
  0x20   :  { %v356_v21 = vpack.c.bf16 %v173_v13, %v172_v12  ;;  %v159_v24 = vmul.f32 %v143_v16, %v111_v19  ;;  %v259_v32 = vadd.f32 1e-06, %v258_v31 }
  0x21   :  { %v174_v25 = vadd.f32 %v158_v23, %v94_v20  ;;  %p373_p4 = pnand %p372_p3, %p366_p0 }
  0x22   :  { %v175_v26 = vadd.f32 %v159_v24, %v95_v22 }
  0x24   :  { %v359_v27 = vpack.c.bf16 %v175_v26, %v174_v25 }
  0x26   :  { %348 = vmatpush3.bf16.xpose.msra.mxu0 %v347_v33  ;;  %v264_v33 = vlaneseq }
  0x27   :  { %349 = vmatprep.subr.bf16.mxu0 %v389_v1 }
  0x28   :  { %v265_v37 = vshrl.u32 %v264_v33, 7 }
  0x2a   :  { %v266_v39 = vsub.s32 0, %v265_v37 }
  0x2e   :  { %351 = vmatpush3.bf16.xpose.msra.mxu0 %v350_v52 }
  0x2f   :  { %352 = vmatprep.subr.bf16.mxu0 %v389_v1 }
  0x36   :  { %354 = vmatpush3.bf16.xpose.msra.mxu0 %v353_v8 }
  0x37   :  { %355 = vmatprep.subr.bf16.mxu0 %v389_v1 }
  0x3e   :  { %357 = vmatpush3.bf16.xpose.msra.mxu0 %v356_v21 }
  0x3f   :  { %358 = vmatprep.subr.bf16.mxu0 %v389_v1  ;;  %v257_v1 = vld [vmem:[%s615_s6] sm:$0x1] }
  0x40   :  { %v260_v36 = vmul.f32 %v259_v32, %v257_v1 }
  0x42   :  { %v261_v38 = vadd.f32 %v260_v36, %v256_v35 }
  0x44   :  { %v267_v40 = vrot.slane %v261_v38, %v266_v39 }
  0x46   :  { %360 = vmatpush3.bf16.xpose.msra.mxu0 %v359_v27 }
  0x4d   :  { %335 = vmatmul.mubr.f32.vlgmr.msra.gmra.mrb[0].mxu0 %v177_v28 }
 0x120   :  { %v244_v41 = vpop.f32.mrb[0].mxu0 }
 0x121   :  { %v269_v42 = vadd.f32 %v267_v40, %v244_v41  ;;  %v336_v43 = vpop.f32.mrb[1].mxu0 }
 0x123   :  { %270 = vst [vmem:[#allocation3] sm:$0xff] %v269_v42 }
 0x124   :  { %376 = shalt.err (!%p373_p4)
}
 0x125   :  { %s377_s11 = scalar_lea.hbm %s616_s7, 128 }
 0x126   :  { %p378_p5 = scmp.ne.s32.totalorder %s616_s7, %s377_s11  ;;  %p381_p6 = scmp.lt.u32.totalorder %s377_s11, %s616_s7 }
 0x128   :  { %p383_p7 = pnand %p381_p6, %p378_p5 }
 0x12a   :  { %386 = shalt.err (!%p383_p7)
}
 0x12b   :  { %280 = dma.vmem_to_hbm [thread:$0]  %s278_s5, 128, %s616_s7, [#allocation4]  }
 0x12c   :  { %387 = dma.done.wait [#allocation4], 128  }
 0x12d   :  { %388 = vsyncadd [#allocation4], 4294967168 }
 0x12e   :  { %284 = vsyncpa [#allocation4], 1 }

</bundles_post_ra>
